<compile_context>
chip_gen: v7x
topology: tpu7x:2x2x1
jax: 0.10.0
libtpu: 0.0.40
codegen_flags: <defaults>
</compile_context>

<pallas_src>
import jax
import jax.numpy as jnp
from jax.experimental import pallas as pl
from jax.experimental.pallas import tpu as pltpu


def flat(x: jax.Array) -> jax.Array:
    """PyTorch `Flat.forward`: x.view(x.size(0), -1).

    A contiguous row-major flatten is a pure layout/metadata change, so the
    recommended forward path does no data movement at all.
    """
    return jnp.reshape(x, (x.shape[0], -1))


# Split the HBM->HBM copy into two DMAs (one per v7x TensorCore) once the
# tensor is big enough for the split to matter.  Below this, one DMA is best.
_SPLIT_BYTES = 256 * 1024


def flat_materialize(x: jax.Array) -> jax.Array:
    """Same semantics as `flat`, but a fresh (batch, feat) buffer is physically
    produced by a direct HBM->HBM DMA issued from a Pallas kernel (no VMEM
    staging, no vector-register traffic)."""
    batch = x.shape[0]
    feat = 1
    for d in x.shape[1:]:
        feat *= d

    # Logical flatten (metadata); the DMA below streams it HBM->HBM.
    x2d = jnp.reshape(x, (batch, feat))

    itemsize = jnp.dtype(x.dtype).itemsize
    nbytes = batch * feat * itemsize

    # 2 contiguous row-halves (one DMA per v7x TensorCore) when the batch
    # splits evenly and the tensor is large enough; otherwise a single DMA.
    # TODO(synk): for odd batch sizes the copy stays a single DMA (could also
    # split along the feature axis, but it is neutral on v5e/v6e anyway).
    num_chunks = 2 if (batch % 2 == 0 and nbytes >= _SPLIT_BYTES) else 1
    rows = batch // num_chunks

    def _dma_flat_kernel(x_hbm, o_hbm, sem):
        # Each grid step copies its contiguous row-chunk HBM->HBM in one DMA.
        start = pl.program_id(0) * rows
        cp = pltpu.make_async_copy(
            x_hbm.at[pl.ds(start, rows)],
            o_hbm.at[pl.ds(start, rows)],
            sem,
        )
        cp.start()
        cp.wait()

    return pl.pallas_call(
        _dma_flat_kernel,
        out_shape=jax.ShapeDtypeStruct((batch, feat), x.dtype),
        grid=(num_chunks,),
        in_specs=[pl.BlockSpec(memory_space=pl.ANY)],
        out_specs=pl.BlockSpec(memory_space=pl.ANY),
        scratch_shapes=[pltpu.SemaphoreType.DMA(())],
        compiler_params=pltpu.CompilerParams(
            # Chunks are independent; lets v7x's two TCs each drive a DMA.
            dimension_semantics=("parallel",),
            has_side_effects=True,
        ),
        cost_estimate=pl.CostEstimate(
            flops=0, transcendentals=0, bytes_accessed=2 * nbytes
        ),
    )(x2d)


if __name__ == "__main__":
    key = jax.random.PRNGKey(0)

    # Small NCHW input consistent with the module: (batch=2, C=4, H=16, W=16).
    x = jax.random.normal(key, (2, 4, 16, 16), dtype=jnp.float32)
    ref = jnp.reshape(x, (x.shape[0], -1))

    # Fast (metadata-only) path — the recommended forward.
    y = flat(x)
    jax.block_until_ready(y)
    assert y.shape == (2, 4 * 16 * 16), y.shape
    assert y.dtype == x.dtype
    assert bool(jnp.array_equal(y, ref))

    # Direct-DMA materializing path on the same (small) input: single DMA.
    y_mat = flat_materialize(x)
    jax.block_until_ready(y_mat)
    assert y_mat.shape == ref.shape and bool(jnp.array_equal(y_mat, ref))

    # Larger input exercising the 2-chunk ("parallel") DMA path:
    # (16, 8, 32, 32) -> (16, 8192), 512 KiB f32 -> 2 DMAs of 8 rows each.
    x2 = jax.random.normal(jax.random.PRNGKey(0), (16, 8, 32, 32), dtype=jnp.float32)
    ref2 = jnp.reshape(x2, (x2.shape[0], -1))
    y2 = flat_materialize(x2)
    jax.block_until_ready(y2)
    assert y2.shape == ref2.shape and bool(jnp.array_equal(y2, ref2))

    print("KERNEL_OK")
</pallas_src>

<mosaic_0001>
module attributes {stable_mosaic.version = 11 : i64} {
  func.func @_dma_flat_kernel(%arg0: i32, %arg1: memref<2x1024xf32, #tpu.memory_space<any>>, %arg2: memref<2x1024xf32, #tpu.memory_space<any>>, %arg3: memref<!tpu.dma_semaphore, #tpu.memory_space<semaphore_mem>>) attributes {dimension_semantics = [#tpu.dimension_semantics<parallel>], iteration_bounds = array<i64: 1>, scalar_prefetch = 0 : i64, scratch_operands = 1 : i64, tpu.core_type = #tpu.core_type<tc>, window_params = [{}, {}]} {
    %c2_i32 = arith.constant 2 : i32
    %0 = arith.muli %arg0, %c2_i32 : i32
    %c0_i32 = arith.constant 0 : i32
    %1 = tpu.memref_slice %arg1[%0, %c0_i32] : memref<2x1024xf32, #tpu.memory_space<any>> -> memref<2x1024xf32, #tpu.memory_space<any>>
    %c0_i32_0 = arith.constant 0 : i32
    %2 = tpu.memref_slice %arg2[%0, %c0_i32_0] : memref<2x1024xf32, #tpu.memory_space<any>> -> memref<2x1024xf32, #tpu.memory_space<any>>
    tpu.enqueue_dma source(%1 : memref<2x1024xf32, #tpu.memory_space<any>>) target(%2 : memref<2x1024xf32, #tpu.memory_space<any>>) target_semaphore(%arg3 : memref<!tpu.dma_semaphore, #tpu.memory_space<semaphore_mem>>)
    %c0_i32_1 = arith.constant 0 : i32
    %3 = tpu.memref_slice %arg1[%0, %c0_i32_1] : memref<2x1024xf32, #tpu.memory_space<any>> -> memref<2x1024xf32, #tpu.memory_space<any>>
    %c0_i32_2 = arith.constant 0 : i32
    %4 = tpu.memref_slice %arg2[%0, %c0_i32_2] : memref<2x1024xf32, #tpu.memory_space<any>> -> memref<2x1024xf32, #tpu.memory_space<any>>
    tpu.wait_dma2 semaphore(%arg3 : memref<!tpu.dma_semaphore, #tpu.memory_space<semaphore_mem>>) src(%3 : memref<2x1024xf32, #tpu.memory_space<any>>) dst(%4 : memref<2x1024xf32, #tpu.memory_space<any>>)
    return
  }
}

</mosaic_0001>

<bundles_post_ra>
// kernel: tpu_custom_call.1
= control target key start
LH: loop header
LB: loop body
LE: loop exit
PB: predicated region body
PF: predicated region fallthrough
CT: control target
= control target key end

     0   :  { %s47_s6 = smov [#allocation2]   ;;  %s48_s7 = smov [#allocation3]   ;;  %s66_s0 = inlined_call_operand.hbm [shape: f32[2,1024], index: 0, kind: input, shape index: {}]   ;;  %s67_s1 = inlined_call_operand.hbm [shape: f32[2,1024], index: 1, kind: output, shape index: {}]  }
   0x1   :  { %s49_s8 = smov 0  }
   0x2   :  { %26 = dma.general %s66_s0, 256, %s67_s1, %s47_s6, %s48_s7, [#allocation4], %s49_s8, 0  }
   0x3   :  { %45 = dma.done.wait [#allocation2], 256 }
   0x4   :  { %46 = vsyncadd [#allocation2], 4294967040 }
   0x5   :  { %31 = vsyncmov [#allocation2] }
   0x8   :  { %s32_s13 = vpop.sfrf %31 }
   0x9   :  { %p41_p0 = scmp.ne.s32.totalorder %s32_s13, 0 }
   0xb   :  { %36 = shalt.err (%p41_p0)  }

</bundles_post_ra>
